<compile_context>
chip_gen: v7x
topology: tpu7x:2x2x1
jax: 0.10.0
libtpu: 0.0.40
codegen_flags: <defaults>
</compile_context>

<pallas_src>
import jax
import jax.numpy as jnp
from jax.experimental import pallas as pl
from jax.experimental.pallas import tpu as pltpu


def _patch_embed_kernel(x_ref, w_ref, b_ref, g_ref, beta_ref, o_ref):
    # x_ref:    (TM, F)  bf16 token tile (streamed)
    # w_ref:    (F, E)   bf16 projection weight (VMEM-resident)
    # b_ref:    (1, E)   f32 projection bias      (VMEM-resident)
    # g_ref:    (1, E)   f32 LayerNorm gamma      (VMEM-resident)
    # beta_ref: (1, E)   f32 LayerNorm beta       (VMEM-resident)
    # o_ref:    (TM, E)  output tile
    #
    # MXU matmul: native bf16 inputs, f32 accumulator.
    y = jnp.dot(x_ref[...], w_ref[...], preferred_element_type=jnp.float32)
    y = y + b_ref[...]

    # LayerNorm over embed dim (biased variance, eps=1e-5, like nn.LayerNorm).
    # Cross-lane mean/var -> XLU slot; rsqrt -> EUP slot; both hidden under DMA.
    mean = jnp.mean(y, axis=-1, keepdims=True)
    centered = y - mean
    var = jnp.mean(centered * centered, axis=-1, keepdims=True)
    inv = jax.lax.rsqrt(var + 1e-5)
    o_ref[...] = ((centered * inv) * g_ref[...] + beta_ref[...]).astype(o_ref.dtype)


def patch_embed(x, w_conv, b_conv, gamma, beta, patch_size, *, tm=512):
    """x: (B, C, H, W) NCHW.  Returns (B, num_patches, embed_dim) in x.dtype."""
    B, C, H, W = x.shape
    p = patch_size
    E = w_conv.shape[0]
    Hp, Wp = H // p, W // p
    L = Hp * Wp
    T = B * L
    F = C * p * p

    # Patch extraction (kernel=stride=p conv == patch gather + matmul).
    # Feature order (c, kh, kw) matches the OIHW Conv2d weight layout.
    # Cast to bf16 *before* the gather so both the gather pass and the
    # kernel's dominant x-tile HBM reads run at half the f32 traffic.
    # TODO(synk): fold the patch gather into the kernel's pipelined DMA
    # ((1,C,1,p,Wp,p) slabs + in-kernel reorder) or switch the producer to
    # NHWC to drop this extra HBM pass entirely.
    xp = x.astype(jnp.bfloat16).reshape(B, C, Hp, p, Wp, p)
    xp = jnp.transpose(xp, (0, 2, 4, 1, 3, 5)).reshape(T, F)

    # Conv weight (E, C, p, p) -> matmul weight (F, E); tiny, stays resident.
    w_mat = w_conv.reshape(E, F).T.astype(jnp.bfloat16)
    b_row = b_conv.reshape(1, E).astype(jnp.float32)
    g_row = gamma.reshape(1, E).astype(jnp.float32)
    beta_row = beta.reshape(1, E).astype(jnp.float32)

    # Token-dim tile: ~512 rows keeps the double-buffered (TM,F)+(TM,E) blocks
    # at a few hundred KiB -> comfortably under the 16/32 MiB scoped-VMEM
    # defaults on v5e/v6e/v7x while sitting on the flat part of the HBM
    # roofline (per-step overhead ~0.35 us amortized).
    tm = min(tm, T)
    if tm < T:
        tm = max(8, (tm // 8) * 8)          # sublane-aligned when tiling
    grid_m = pl.cdiv(T, tm)

    out = pl.pallas_call(
        _patch_embed_kernel,
        out_shape=jax.ShapeDtypeStruct((T, E), x.dtype),
        grid=(grid_m,),
        in_specs=[
            pl.BlockSpec((tm, F), lambda i: (i, 0)),   # streamed token tiles
            pl.BlockSpec((F, E), lambda i: (0, 0)),    # resident weight
            pl.BlockSpec((1, E), lambda i: (0, 0)),    # resident bias
            pl.BlockSpec((1, E), lambda i: (0, 0)),    # resident gamma
            pl.BlockSpec((1, E), lambda i: (0, 0)),    # resident beta
        ],
        out_specs=pl.BlockSpec((tm, E), lambda i: (i, 0)),
        compiler_params=pltpu.CompilerParams(
            # Row blocks are fully independent -> parallel grid axis
            # (no-op on single-TC v5e/v6e, 2-core sharding on v7x).
            dimension_semantics=("parallel",)),
    )(xp, w_mat, b_row, g_row, beta_row)

    return out.reshape(B, L, E)


if __name__ == "__main__":
    # Small shapes consistent with the module: img_size=16, patch_size=4,
    # in_chans=4, embed_dim=32, batch=2  ->  num_patches = (16//4)**2 = 16.
    B, C, H, W = 2, 4, 16, 16
    patch_size = 4
    embed_dim = 32

    key = jax.random.PRNGKey(0)
    kx, kw, kb, kg, kbt = jax.random.split(key, 5)

    x = jax.random.normal(kx, (B, C, H, W), dtype=jnp.float32)
    # Deterministic synthetic parameters (shapes from nn.Conv2d / nn.LayerNorm).
    w_conv = jax.random.normal(kw, (embed_dim, C, patch_size, patch_size),
                               dtype=jnp.float32) * 0.05
    b_conv = jax.random.normal(kb, (embed_dim,), dtype=jnp.float32) * 0.01
    gamma = jnp.ones((embed_dim,), dtype=jnp.float32) + \
        0.01 * jax.random.normal(kg, (embed_dim,), dtype=jnp.float32)
    beta = 0.01 * jax.random.normal(kbt, (embed_dim,), dtype=jnp.float32)

    out = patch_embed(x, w_conv, b_conv, gamma, beta, patch_size)
    out = jax.block_until_ready(out)

    # Pure-JAX f32 reference (matches the PyTorch module semantics).
    y_ref = jax.lax.conv_general_dilated(
        x, w_conv, window_strides=(patch_size, patch_size), padding="VALID",
        dimension_numbers=("NCHW", "OIHW", "NCHW"))
    y_ref = y_ref + b_conv[None, :, None, None]
    y_ref = y_ref.reshape(B, embed_dim, -1).transpose(0, 2, 1)
    mu = y_ref.mean(-1, keepdims=True)
    var = ((y_ref - mu) ** 2).mean(-1, keepdims=True)
    y_ref = (y_ref - mu) / jnp.sqrt(var + 1e-5) * gamma + beta

    assert out.shape == (B, (H // patch_size) * (W // patch_size), embed_dim)
    # bf16 matmul inputs (f32 accumulation) vs. pure-f32 reference -> loosened
    # tolerance, per the review's correctness note.
    assert jnp.allclose(out, y_ref, atol=5e-2, rtol=5e-2)
    print("KERNEL_OK")
</pallas_src>

<mosaic_0001>
module attributes {stable_mosaic.version = 11 : i64} {
  func.func @_patch_embed_kernel(%arg0: i32, %arg1: memref<32x64xbf16, #tpu.memory_space<vmem>>, %arg2: memref<64x32xbf16, #tpu.memory_space<vmem>>, %arg3: memref<1x32xf32, #tpu.memory_space<vmem>>, %arg4: memref<1x32xf32, #tpu.memory_space<vmem>>, %arg5: memref<1x32xf32, #tpu.memory_space<vmem>>, %arg6: memref<32x32xf32, #tpu.memory_space<vmem>>) attributes {dimension_semantics = [#tpu.dimension_semantics<parallel>], iteration_bounds = array<i64: 1>, scalar_prefetch = 0 : i64, scratch_operands = 0 : i64, tpu.core_type = #tpu.core_type<tc>, window_params = [{transform_indices = @transform_0, window_bounds = array<i64: 32, 64>}, {pipeline_mode = #tpu.pipeline_mode<synchronous>, transform_indices = @transform_1, window_bounds = array<i64: 64, 32>}, {pipeline_mode = #tpu.pipeline_mode<synchronous>, transform_indices = @transform_2, window_bounds = array<i64: 1, 32>}, {pipeline_mode = #tpu.pipeline_mode<synchronous>, transform_indices = @transform_3, window_bounds = array<i64: 1, 32>}, {pipeline_mode = #tpu.pipeline_mode<synchronous>, transform_indices = @transform_4, window_bounds = array<i64: 1, 32>}, {transform_indices = @transform_5, window_bounds = array<i64: 32, 32>}]} {
    %c0 = arith.constant 0 : index
    %c0_0 = arith.constant 0 : index
    %0 = vector.load %arg1[%c0, %c0_0] : memref<32x64xbf16, #tpu.memory_space<vmem>>, vector<32x64xbf16>
    %c0_1 = arith.constant 0 : index
    %c0_2 = arith.constant 0 : index
    %1 = vector.load %arg2[%c0_1, %c0_2] : memref<64x32xbf16, #tpu.memory_space<vmem>>, vector<64x32xbf16>
    %cst = arith.constant dense<0.000000e+00> : vector<32x32xf32>
    %2 = tpu.matmul %0, %1, %cst {dimension_numbers = #tpu.dot_dimension_numbers<[1], [0], [0], [1], [0, 0, 1, 1], [], []>} : vector<32x64xbf16>, vector<64x32xbf16>, vector<32x32xf32> -> vector<32x32xf32>
    %c0_3 = arith.constant 0 : index
    %c0_4 = arith.constant 0 : index
    %3 = vector.load %arg3[%c0_3, %c0_4] : memref<1x32xf32, #tpu.memory_space<vmem>>, vector<1x32xf32>
    %4 = vector.broadcast %3 : vector<1x32xf32> to vector<32x32xf32>
    %5 = arith.addf %2, %4 : vector<32x32xf32>
    %cst_5 = arith.constant dense<0.000000e+00> : vector<32xf32>
    %6 = vector.multi_reduction <add>, %5, %cst_5 [1] : vector<32x32xf32> to vector<32xf32>
    %7 = vector.shape_cast %6 : vector<32xf32> to vector<32x1xf32>
    %cst_6 = arith.constant 3.200000e+01 : f32
    %8 = vector.broadcast %cst_6 : f32 to vector<32x1xf32>
    %9 = arith.divf %7, %8 : vector<32x1xf32>
    %10 = vector.broadcast %9 : vector<32x1xf32> to vector<32x32xf32>
    %11 = arith.subf %5, %10 : vector<32x32xf32>
    %12 = arith.mulf %11, %11 : vector<32x32xf32>
    %cst_7 = arith.constant dense<0.000000e+00> : vector<32xf32>
    %13 = vector.multi_reduction <add>, %12, %cst_7 [1] : vector<32x32xf32> to vector<32xf32>
    %14 = vector.shape_cast %13 : vector<32xf32> to vector<32x1xf32>
    %cst_8 = arith.constant 3.200000e+01 : f32
    %15 = vector.broadcast %cst_8 : f32 to vector<32x1xf32>
    %16 = arith.divf %14, %15 : vector<32x1xf32>
    %cst_9 = arith.constant 9.99999974E-6 : f32
    %17 = vector.broadcast %cst_9 : f32 to vector<32x1xf32>
    %18 = arith.addf %16, %17 : vector<32x1xf32>
    %19 = math.rsqrt %18 : vector<32x1xf32>
    %20 = vector.broadcast %19 : vector<32x1xf32> to vector<32x32xf32>
    %21 = arith.mulf %11, %20 : vector<32x32xf32>
    %c0_10 = arith.constant 0 : index
    %c0_11 = arith.constant 0 : index
    %22 = vector.load %arg4[%c0_10, %c0_11] : memref<1x32xf32, #tpu.memory_space<vmem>>, vector<1x32xf32>
    %23 = vector.broadcast %22 : vector<1x32xf32> to vector<32x32xf32>
    %24 = arith.mulf %21, %23 : vector<32x32xf32>
    %c0_12 = arith.constant 0 : index
    %c0_13 = arith.constant 0 : index
    %25 = vector.load %arg5[%c0_12, %c0_13] : memref<1x32xf32, #tpu.memory_space<vmem>>, vector<1x32xf32>
    %26 = vector.broadcast %25 : vector<1x32xf32> to vector<32x32xf32>
    %27 = arith.addf %24, %26 : vector<32x32xf32>
    %c0_14 = arith.constant 0 : index
    %c0_15 = arith.constant 0 : index
    %28 = vector.load %arg6[%c0_14, %c0_15] : memref<32x32xf32, #tpu.memory_space<vmem>>, vector<32x32xf32>
    tpu.vector_store %arg6[%c0_14, %c0_15], %27 {strides = array<i32>} : memref<32x32xf32, #tpu.memory_space<vmem>>, vector<32x32xf32>,
    return
  }
  func.func @transform_0(%arg0: i32) -> (i32, i32) {
    %c0_i32 = arith.constant 0 : i32
    %c0_i32_0 = arith.constant 0 : i32
    return %arg0, %c0_i32 : i32, i32
  }
  func.func @transform_1(%arg0: i32) -> (i32, i32) {
    %c0_i32 = arith.constant 0 : i32
    %c0_i32_0 = arith.constant 0 : i32
    %c0_i32_1 = arith.constant 0 : i32
    return %c0_i32, %c0_i32_0 : i32, i32
  }
  func.func @transform_2(%arg0: i32) -> (i32, i32) {
    %c0_i32 = arith.constant 0 : i32
    %c0_i32_0 = arith.constant 0 : i32
    %c0_i32_1 = arith.constant 0 : i32
    return %c0_i32, %c0_i32_0 : i32, i32
  }
  func.func @transform_3(%arg0: i32) -> (i32, i32) {
    %c0_i32 = arith.constant 0 : i32
    %c0_i32_0 = arith.constant 0 : i32
    %c0_i32_1 = arith.constant 0 : i32
    return %c0_i32, %c0_i32_0 : i32, i32
  }
  func.func @transform_4(%arg0: i32) -> (i32, i32) {
    %c0_i32 = arith.constant 0 : i32
    %c0_i32_0 = arith.constant 0 : i32
    %c0_i32_1 = arith.constant 0 : i32
    return %c0_i32, %c0_i32_0 : i32, i32
  }
  func.func @transform_5(%arg0: i32) -> (i32, i32) {
    %c0_i32 = arith.constant 0 : i32
    %c0_i32_0 = arith.constant 0 : i32
    return %arg0, %c0_i32 : i32, i32
  }
}

</mosaic_0001>

<bundles_post_ra>
// kernel: tpu_custom_call.1
= control target key start
LH: loop header
LB: loop body
LE: loop exit
PB: predicated region body
PF: predicated region fallthrough
CT: control target
= control target key end

     0   :  { %vm75_vm0 = vcmask 523264   ;;  %s381_s0 = inlined_call_operand.vmem [shape: bf16[32,64], index: 0, kind: input, shape index: {}]   ;;  %s382_s1 = inlined_call_operand.vmem [shape: bf16[64,32], index: 1, kind: input, shape index: {}]   ;;  %s383_s2 = inlined_call_operand.vmem [shape: f32[1,32], index: 2, kind: input, shape index: {}]   ;;  %s384_s3 = inlined_call_operand.vmem [shape: f32[1,32], index: 3, kind: input, shape index: {}]   ;;  %s385_s4 = inlined_call_operand.vmem [shape: f32[1,32], index: 4, kind: input, shape index: {}]   ;;  %s386_s5 = inlined_call_operand.hbm [shape: f32[32,32], index: 5, kind: output, shape index: {}]  }
   0x1   :  { %v259_v0 = vld [vmem:[%s382_s1] sm:$0xff]   ;;  %v260_v1 = vld [vmem:[%s382_s1 + $0x8] sm:$0xff]   ;;  %v261_v2 = vld [vmem:[%s382_s1 + $0x10] sm:$0xff]  }
   0x2   :  { %244 = vmatprep.subr.bf16.mxu0 %v259_v0  ;;  %v263_v3 = vld [vmem:[%s381_s0] sm:$0xff]  }
   0x3   :  { %245 = vmatpush3.bf16.msra.mxu0 %v259_v0  ;;  %252 = vmatprep.mubr.msk.bf16.mxu0 %vm75_vm0, %v263_v3 }
   0x4   :  { %246 = vmatprep.subr.bf16.mxu0 %v260_v1 }
   0x5   :  { %10 = vsyncpa [#allocation3], 0  ;;  %v262_v4 = vld [vmem:[%s382_s1 + $0x18] sm:$0xff]   ;;  %v264_v5 = vld [vmem:[%s381_s0 + $0x8] sm:$0xff]   ;;  %vm131_vm1 = vcmask 261120  }
   0x6   :  { %v227_v6 = vld [vmem:[%s383_s2] ss:$0 sm:$0xff] }
   0x7   :  { %247 = vmatpush3.bf16.msra.mxu0 %v260_v1  ;;  %v236_v52 = vld [vmem:[%s384_s3] ss:$0 sm:$0xff]  ;;  %s297_s3 = smov [#allocation2]  }
   0x8   :  { %248 = vmatprep.subr.bf16.mxu0 %v261_v2  ;;  %v237_v54 = vld [vmem:[%s385_s4] ss:$0 sm:$0xff]  ;;  %s216_s8 = sshll.u32 %s297_s3, 4  ;;  %s217_s8 = int_to_ptr.vmem [resolvable:$true] %s216_s8 }
   0x9   :  { %s273_s4 = scalar_lea.vmem %s217_s8, 512  ;;  %p278_p1 = scmp.lt.s32.totalorder %s217_s8, %s217_s8 }
   0xa   :  { %p274_p0 = scmp.ne.s32.totalorder %s217_s8, %s273_s4  ;;  %p279_p2 = scmp.lt.s32.totalorder %s273_s4, %s273_s4 }
   0xb   :  { %249 = vmatpush3.bf16.msra.mxu0 %v261_v2 }
   0xc   :  { %250 = vmatprep.subr.bf16.mxu0 %v262_v4  ;;  %p280_p3 = por %p279_p2, %p278_p1 }
   0xe   :  { %p281_p4 = pnand %p280_p3, %p274_p0 }
   0xf   :  { %251 = vmatpush3.bf16.msra.mxu0 %v262_v4 }
  0x12   :  { %253 = vmatmul.mubr.msk.bf16.vlgmr.msra.gmra.mrb[0].mxu0 %vm75_vm0, %v264_v5 }
  0xe5   :  { %v254_v7 = vpop.f32.mrb[0].mxu0 }
  0xe6   :  { %v125_v8 = vadd.f32 %v254_v7, %v227_v6  ;;  %v116_v9 = vpop.f32.mrb[1].mxu0 }
  0xe7   :  { %v117_v10 = vadd.f32 %v227_v6, %v116_v9  ;;  %v255_v11 = vpop.f32.mrb[2].mxu0 }
  0xe8   :  { %v128_v12 = vadd.f32 %v255_v11, %v227_v6  ;;  %v119_v13 = vpop.f32.mrb[3].mxu0  ;;  %v138_v14 = vsel %vm131_vm1, %v125_v8, 0.0 }
  0xe9   :  { %v120_v15 = vadd.f32 %v227_v6, %v119_v13  ;;  %139 = vadd.xlane.f32.xlu1 %v138_v14  ;;  %v132_v16 = vsel %vm131_vm1, %v117_v10, 0.0 }
  0xea   :  { %133 = vadd.xlane.f32.xlu0 %v132_v16  ;;  %v141_v17 = vsel %vm131_vm1, %v128_v12, 0.0 }
  0xeb   :  { %v135_v18 = vsel %vm131_vm1, %v120_v15, 0.0 }
  0xed   :  { %142 = vadd.xlane.f32.xlu1 %v141_v17 }
  0xee   :  { %136 = vadd.xlane.f32.xlu0 %v135_v18 }
 0x176   :  { %v140_v19 = vpop.xlane.xlu1 %139 }
 0x177   :  { %v147_v20 = vmul.f32 0.03125, %v140_v19  ;;  %v134_v21 = vpop.xlane.xlu0 %133 }
 0x178   :  { %v145_v22 = vmul.f32 0.03125, %v134_v21 }
 0x179   :  { %v151_v23 = vsub.f32 %v125_v8, %v147_v20 }
 0x17a   :  { %v149_v24 = vsub.f32 %v117_v10, %v145_v22  ;;  %v143_v25 = vpop.xlane.xlu1 %142 }
 0x17b   :  { %v148_v26 = vmul.f32 0.03125, %v143_v25  ;;  %v137_v27 = vpop.xlane.xlu0 %136  ;;  %v155_v33 = vmul.f32 %v151_v23, %v151_v23 }
 0x17c   :  { %v146_v28 = vmul.f32 0.03125, %v137_v27  ;;  %v153_v29 = vmul.f32 %v149_v24, %v149_v24 }
 0x17d   :  { %v152_v30 = vsub.f32 %v128_v12, %v148_v26  ;;  %v163_v35 = vsel %vm131_vm1, %v155_v33, 0.0 }
 0x17e   :  { %v150_v31 = vsub.f32 %v120_v15, %v146_v28  ;;  %v157_v32 = vsel %vm131_vm1, %v153_v29, 0.0 }
 0x17f   :  { %158 = vadd.xlane.f32.xlu0 %v157_v32  ;;  %v156_v37 = vmul.f32 %v152_v30, %v152_v30 }
 0x180   :  { %v154_v34 = vmul.f32 %v150_v31, %v150_v31 }
 0x181   :  { %v166_v38 = vsel %vm131_vm1, %v156_v37, 0.0 }
 0x182   :  { %v160_v36 = vsel %vm131_vm1, %v154_v34, 0.0 }
 0x183   :  { %164 = vadd.xlane.f32.xlu0 %v163_v35  ;;  %161 = vadd.xlane.f32.xlu1 %v160_v36 }
 0x187   :  { %167 = vadd.xlane.f32.xlu1 %v166_v38 }
 0x20c   :  { %v159_v39 = vpop.xlane.xlu0 %158 }
 0x20d   :  { %v169_v40 = vmul.f32 0.03125, %v159_v39 }
 0x20f   :  { %v173_v41 = vadd.f32 1e-05, %v169_v40 }
 0x210   :  { %v162_v42 = vpop.xlane.xlu1 %161  ;;  %v165_v43 = vpop.xlane.xlu0 %164 }
 0x211   :  { %265 = vrsqrt.f32 %v173_v41  ;;  %v170_v44 = vmul.f32 0.03125, %v162_v42  ;;  %v171_v45 = vmul.f32 0.03125, %v165_v43 }
 0x213   :  { %v174_v46 = vadd.f32 1e-05, %v170_v44  ;;  %v175_v47 = vadd.f32 1e-05, %v171_v45 }
 0x214   :  { %v168_v48 = vpop.xlane.xlu1 %167 }
 0x215   :  { %267 = vrsqrt.f32 %v174_v46  ;;  %v172_v49 = vmul.f32 0.03125, %v168_v48 }
 0x216   :  { %269 = vrsqrt.f32 %v175_v47 }
 0x217   :  { %v176_v50 = vadd.f32 1e-05, %v172_v49 }
 0x219   :  { %271 = vrsqrt.f32 %v176_v50 }
 0x21b   :  { %v266_v51 = vpop.eup %265 }
 0x21c   :  { %v181_v53 = vmul.f32 %v266_v51, %v149_v24 }
 0x21e   :  { %v192_v55 = vmul.f32 %v236_v52, %v181_v53 }
 0x21f   :  { %v268_v56 = vpop.eup %267 }
 0x220   :  { %v270_v57 = vpop.eup %269  ;;  %v203_v58 = vadd.f32 %v237_v54, %v192_v55  ;;  %v182_v59 = vmul.f32 %v268_v56, %v150_v31 }
 0x221   :  { %v183_v60 = vmul.f32 %v270_v57, %v151_v23 }
 0x222   :  { %207 = vst.msk [vmem:[#allocation2] sm:$0xff] %vm131_vm1, %v203_v58  ;;  %v193_v61 = vmul.f32 %v236_v52, %v182_v59 }
 0x223   :  { %v272_v62 = vpop.eup %271  ;;  %v194_v63 = vmul.f32 %v236_v52, %v183_v60 }
 0x224   :  { %v204_v0 = vadd.f32 %v237_v54, %v193_v61  ;;  %v184_v1 = vmul.f32 %v272_v62, %v152_v30 }
 0x225   :  { %v205_v2 = vadd.f32 %v237_v54, %v194_v63 }
 0x226   :  { %208 = vst.msk [vmem:[#allocation2 + $0x8] sm:$0xff] %vm131_vm1, %v204_v0  ;;  %v195_v3 = vmul.f32 %v236_v52, %v184_v1 }
 0x227   :  { %209 = vst.msk [vmem:[#allocation2 + $0x10] sm:$0xff] %vm131_vm1, %v205_v2 }
 0x228   :  { %v206_v4 = vadd.f32 %v237_v54, %v195_v3 }
 0x22a   :  { %210 = vst.msk [vmem:[#allocation2 + $0x18] sm:$0xff] %vm131_vm1, %v206_v4 }
 0x22b   :  { %284 = shalt.err (!%p281_p4)
}
 0x22c   :  { %s285_s11 = scalar_lea.hbm %s386_s5, 512 }
 0x22d   :  { %p286_p5 = scmp.ne.s32.totalorder %s386_s5, %s285_s11  ;;  %p289_p6 = scmp.lt.u32.totalorder %s285_s11, %s386_s5 }
 0x22f   :  { %p291_p7 = pnand %p289_p6, %p286_p5 }
 0x231   :  { %294 = shalt.err (!%p291_p7)
}
 0x232   :  { %s298_s16 = smov 128   ;;  %s299_s17 = smov 8  }
 0x233   :  { %222 = dma.vmem_to_hbm [thread:$0]  %s217_s8, 512, %s386_s5, [#allocation3], %s298_s16, %s298_s16, %s299_s17  }
 0x234   :  { %295 = dma.done.wait [#allocation3], 512  }
 0x235   :  { %296 = vsyncadd [#allocation3], 4294966784 }
 0x236   :  { %226 = vsyncpa [#allocation3], 1 }

</bundles_post_ra>
